<compile_context>
chip_gen: v7x
topology: tpu7x:2x2x1
jax: 0.10.0
libtpu: 0.0.40
codegen_flags: <defaults>
</compile_context>

<pallas_src>
import functools

import jax
import jax.numpy as jnp
from jax.experimental import pallas as pl
from jax.experimental.pallas import tpu as pltpu

_MAX_TILE_ROWS = 512          # ~85% of HBM roofline already at 512 rows
_FALLBACK_VMEM_BYTES = 64 * 1024 * 1024   # v7x per-TC VMEM (most restrictive)


@functools.lru_cache(maxsize=1)
def _vmem_budgets() -> tuple[int, int]:
    """(tile-sizing budget, scoped vmem_limit_bytes) derived from the chip."""
    cap = _FALLBACK_VMEM_BYTES
    try:
        info = pltpu.get_tpu_info()
        cap = int(getattr(info, "vmem_capacity_bytes", cap)) or cap
    except Exception:
        pass  # no TPU info available at trace time -> conservative fallback
    budget = max(8 * 1024 * 1024, int(cap * 0.30))        # blocks + f32 temps
    limit = max(budget + 4 * 1024 * 1024, cap - 8 * 1024 * 1024)  # Mosaic scratch headroom
    return budget, limit


def _rmsnorm_kernel(x_ref, w_ref, o_ref, *, eps: float, inv_dim: float,
                    fuse_scale_in_f32: bool):
    # x_ref: (tile_rows, dim) block; w_ref: (1, dim) resident weight.
    x = x_ref[...].astype(jnp.float32)
    # sum-of-squares on the XLU, compile-time 1/dim scale (no VPU divide)
    ms = jnp.sum(x * x, axis=-1, keepdims=True) * inv_dim
    inv = jax.lax.rsqrt(ms + eps)                      # EUP slot, effectively free
    if fuse_scale_in_f32:
        # Single f32 pass + one downcast: fewer narrow-dtype VPU ops, no
        # tile-sized `normed` temp in VMEM.
        o_ref[...] = (x * inv * w_ref[...].astype(jnp.float32)).astype(o_ref.dtype)
    else:
        # Bit-matches torch: downcast to activation dtype, then scale.
        normed = (x * inv).astype(o_ref.dtype)
        o_ref[...] = normed * w_ref[...]


def _pick_tile_rows(rows: int, dim: int, dtype) -> int:
    """Largest sublane-aligned row tile whose blocks + f32 temps fit the budget."""
    itemsize = jnp.dtype(dtype).itemsize
    sublane = max(8, 32 // itemsize)       # 8 for f32, 16 for bf16, 32 for int8/fp8
    # 2x double-buffered input blocks + 2x output blocks, PLUS ~2 whole-tile f32
    # temporaries per row created by the in-kernel upcast / product.
    bytes_per_row = 4 * dim * itemsize + 2 * dim * 4
    budget, _ = _vmem_budgets()
    budget_rows = max(sublane, budget // max(bytes_per_row, 1))

    tile = min(_MAX_TILE_ROWS, budget_rows, pl.cdiv(rows, sublane) * sublane)
    tile = max(sublane, (tile // sublane) * sublane)

    # Best effort: make the 1-D grid step count even so "parallel" sharding
    # keeps both v7x TensorCores busy (no-op on single-TC v5e/v6e).  Never
    # shrink below half the budget tile just for parity.
    if rows > tile:
        cand = tile
        best = tile
        while cand >= sublane:
            if pl.cdiv(rows, cand) % 2 == 0:
                best = cand
                break
            cand -= sublane
        if best >= max(sublane, tile // 2):
            tile = best
    return tile


def rmsnorm(x: jax.Array, weight: jax.Array, eps: float = 1e-6,
            tile_rows: int | None = None,
            fuse_scale_in_f32: bool = True) -> jax.Array:
    """RMSNorm over the last axis of `x`, scaled by `weight` (shape (dim,))."""
    orig_shape = x.shape
    dim = orig_shape[-1]
    assert weight.shape == (dim,)

    x2d = x.reshape(-1, dim)
    rows = x2d.shape[0]

    if tile_rows is None:
        tile_rows = _pick_tile_rows(rows, dim, x.dtype)

    # Resident (1, dim) weight.  Keep it in f32 for the fused path (weight is
    # an f32 parameter in the reference); otherwise pre-cast once here.
    w_dtype = jnp.float32 if fuse_scale_in_f32 else x.dtype
    w2d = weight.reshape(1, dim).astype(w_dtype)

    _, vmem_limit = _vmem_budgets()

    # No explicit padding: Pallas masks the writeback of the partial last block
    # and the tail rows' garbage results are discarded (rows are independent).
    grid = (pl.cdiv(rows, tile_rows),)

    # TODO(synk): if an xprof trace shows exposed input DMA between grid steps,
    # bump the input BlockSpec to pipeline_mode=pl.Buffered(3).
    out = pl.pallas_call(
        functools.partial(_rmsnorm_kernel, eps=eps, inv_dim=1.0 / dim,
                          fuse_scale_in_f32=fuse_scale_in_f32),
        out_shape=jax.ShapeDtypeStruct((rows, dim), x.dtype),
        grid_spec=pltpu.PrefetchScalarGridSpec(
            num_scalar_prefetch=0,
            grid=grid,
            in_specs=[
                pl.BlockSpec((tile_rows, dim), lambda i: (i, 0)),
                pl.BlockSpec((1, dim), lambda i: (0, 0)),   # weight stays resident
            ],
            out_specs=pl.BlockSpec((tile_rows, dim), lambda i: (i, 0)),
        ),
        compiler_params=pltpu.CompilerParams(
            dimension_semantics=("parallel",),
            vmem_limit_bytes=vmem_limit),
    )(x2d, w2d)

    return out.reshape(orig_shape)


def rmsnorm_ref(x, weight, eps=1e-6):
    xf = x.astype(jnp.float32)
    inv = jax.lax.rsqrt(jnp.mean(xf * xf, axis=-1, keepdims=True) + eps)
    return (xf * inv).astype(x.dtype) * weight.astype(x.dtype)


if __name__ == "__main__":
    key = jax.random.PRNGKey(0)
    # Small but lane-dense (dim % 128 == 0) so the fast store path is exercised.
    batch, seq, dim = 2, 8, 128
    x = jax.random.normal(key, (batch, seq, dim), dtype=jnp.float32)
    # Deterministic parameter init: nn.Parameter(torch.ones(dim))
    weight = jnp.ones((dim,), dtype=jnp.float32)

    out = rmsnorm(x, weight, eps=1e-6)
    out = jax.block_until_ready(out)

    ref = rmsnorm_ref(x, weight, eps=1e-6)
    assert out.shape == x.shape and out.dtype == x.dtype
    assert jnp.allclose(out, ref, atol=1e-5, rtol=1e-5)

    print("KERNEL_OK")
</pallas_src>

<mosaic_0001>
module attributes {stable_mosaic.version = 11 : i64} {
  func.func @_rmsnorm_kernel(%arg0: i32, %arg1: memref<16x128xf32, #tpu.memory_space<vmem>>, %arg2: memref<1x128xf32, #tpu.memory_space<vmem>>, %arg3: memref<16x128xf32, #tpu.memory_space<vmem>>) attributes {dimension_semantics = [#tpu.dimension_semantics<parallel>], iteration_bounds = array<i64: 1>, scalar_prefetch = 0 : i64, scratch_operands = 0 : i64, tpu.core_type = #tpu.core_type<tc>, window_params = [{transform_indices = @transform_0, window_bounds = array<i64: 16, 128>}, {pipeline_mode = #tpu.pipeline_mode<synchronous>, transform_indices = @transform_1, window_bounds = array<i64: 1, 128>}, {transform_indices = @transform_2, window_bounds = array<i64: 16, 128>}]} {
    %c0 = arith.constant 0 : index
    %c0_0 = arith.constant 0 : index
    %0 = vector.load %arg1[%c0, %c0_0] : memref<16x128xf32, #tpu.memory_space<vmem>>, vector<16x128xf32>
    %1 = arith.mulf %0, %0 : vector<16x128xf32>
    %cst = arith.constant dense<0.000000e+00> : vector<16xf32>
    %2 = vector.multi_reduction <add>, %1, %cst [1] : vector<16x128xf32> to vector<16xf32>
    %3 = vector.shape_cast %2 : vector<16xf32> to vector<16x1xf32>
    %cst_1 = arith.constant 7.812500e-03 : f32
    %4 = vector.broadcast %cst_1 : f32 to vector<16x1xf32>
    %5 = arith.mulf %3, %4 : vector<16x1xf32>
    %cst_2 = arith.constant 9.99999997E-7 : f32
    %6 = vector.broadcast %cst_2 : f32 to vector<16x1xf32>
    %7 = arith.addf %5, %6 : vector<16x1xf32>
    %8 = math.rsqrt %7 : vector<16x1xf32>
    %9 = vector.broadcast %8 : vector<16x1xf32> to vector<16x128xf32>
    %10 = arith.mulf %0, %9 : vector<16x128xf32>
    %c0_3 = arith.constant 0 : index
    %c0_4 = arith.constant 0 : index
    %11 = vector.load %arg2[%c0_3, %c0_4] : memref<1x128xf32, #tpu.memory_space<vmem>>, vector<1x128xf32>
    %12 = vector.broadcast %11 : vector<1x128xf32> to vector<16x128xf32>
    %13 = arith.mulf %10, %12 : vector<16x128xf32>
    %c0_5 = arith.constant 0 : index
    %c0_6 = arith.constant 0 : index
    %14 = vector.load %arg3[%c0_5, %c0_6] : memref<16x128xf32, #tpu.memory_space<vmem>>, vector<16x128xf32>
    tpu.vector_store %arg3[%c0_5, %c0_6], %13 {strides = array<i32>} : memref<16x128xf32, #tpu.memory_space<vmem>>, vector<16x128xf32>,
    return
  }
  func.func @transform_0(%arg0: i32) -> (i32, i32) {
    %c0_i32 = arith.constant 0 : i32
    %c0_i32_0 = arith.constant 0 : i32
    return %arg0, %c0_i32 : i32, i32
  }
  func.func @transform_1(%arg0: i32) -> (i32, i32) {
    %c0_i32 = arith.constant 0 : i32
    %c0_i32_0 = arith.constant 0 : i32
    %c0_i32_1 = arith.constant 0 : i32
    return %c0_i32, %c0_i32_0 : i32, i32
  }
  func.func @transform_2(%arg0: i32) -> (i32, i32) {
    %c0_i32 = arith.constant 0 : i32
    %c0_i32_0 = arith.constant 0 : i32
    return %arg0, %c0_i32 : i32, i32
  }
}

</mosaic_0001>

<bundles_post_ra>
// kernel: tpu_custom_call.1
= control target key start
LH: loop header
LB: loop body
LE: loop exit
PB: predicated region body
PF: predicated region fallthrough
CT: control target
= control target key end

     0   :  { %7 = vsyncpa [#allocation3], 0  ;;  %s179_s0 = inlined_call_operand.hbm [shape: f32[16,128], index: 0, kind: input, shape index: {}]   ;;  %s180_s1 = inlined_call_operand.vmem [shape: f32[1,128], index: 1, kind: input, shape index: {}]   ;;  %s181_s2 = inlined_call_operand.hbm [shape: f32[16,128], index: 2, kind: output, shape index: {}]  }
   0x1   :  { %8 = vsyncpa [#allocation4], 0  ;;  %s127_s9 = smov [#allocation2]   ;;  %s79_s13 = scalar_lea.hbm %s179_s0, 256 }
   0x2   :  { %s14_s10 = sshll.u32 %s127_s9, 4  ;;  %p80_p0 = scmp.ne.s32.totalorder %s179_s0, %s79_s13  ;;  %s15_s10 = int_to_ptr.vmem [resolvable:$true] %s14_s10 }
   0x3   :  { %p83_p1 = scmp.lt.u32.totalorder %s79_s13, %s179_s0 }
   0x5   :  { %p85_p2 = pnand %p83_p1, %p80_p0 }
   0x7   :  { %88 = shalt.err (!%p85_p2)
}
   0x8   :  { %s89_s18 = scalar_lea.vmem %s15_s10, 256  ;;  %p94_p4 = scmp.lt.s32.totalorder %s15_s10, %s15_s10 }
   0x9   :  { %p90_p3 = scmp.ne.s32.totalorder %s15_s10, %s89_s18  ;;  %p95_p5 = scmp.lt.s32.totalorder %s89_s18, %s89_s18 }
   0xb   :  { %p96_p6 = por %p95_p5, %p94_p4 }
   0xd   :  { %p97_p7 = pnand %p96_p6, %p90_p3 }
   0xf   :  { %100 = shalt.err (!%p97_p7)
}
  0x10   :  { %s128_s19 = smov 128   ;;  %s129_s20 = smov 8  }
  0x11   :  { %20 = dma.hbm_to_vmem [thread:$0]  %s179_s0, 256, %s15_s10, [#allocation3], %s128_s19, %s128_s19, %s129_s20  }
  0x12   :  { %123 = dma.done.wait [#allocation3], 256  }
  0x13   :  { %124 = vsyncadd [#allocation3], 4294967040  ;;  %v26_v0 = vld [vmem:[#allocation2] sm:$0xff]  ;;  %v27_v1 = vld [vmem:[#allocation2 + $0x8] sm:$0xff]  ;;  %s130_s0 = smov [#allocation5]  }
  0x14   :  { %v28_v2 = vmul.f32 %v26_v0, %v26_v0  ;;  %v29_v3 = vmul.f32 %v27_v1, %v27_v1  ;;  %v70_v11 = vld [vmem:[%s180_s1] ss:$0 sm:$0xff]  ;;  %s58_s25 = sshll.u32 %s130_s0, 4  ;;  %s59_s25 = int_to_ptr.vmem [resolvable:$true] %s58_s25 }
  0x15   :  { %s101_s26 = scalar_lea.vmem %s59_s25, 256  ;;  %p106_p9 = scmp.lt.s32.totalorder %s59_s25, %s59_s25 }
  0x16   :  { %30 = vadd.xlane.f32.xlu0 %v28_v2  ;;  %p102_p8 = scmp.ne.s32.totalorder %s59_s25, %s101_s26  ;;  %p107_p10 = scmp.lt.s32.totalorder %s101_s26, %s101_s26 }
  0x18   :  { %p108_p11 = por %p107_p10, %p106_p9 }
  0x1a   :  { %32 = vadd.xlane.f32.xlu0 %v29_v3  ;;  %p109_p12 = pnand %p108_p11, %p102_p8 }
  0xa3   :  { %v31_v4 = vpop.xlane.xlu0 %30 }
  0xa4   :  { %v34_v5 = vmul.f32 0.0078125, %v31_v4 }
  0xa6   :  { %v36_v6 = vadd.f32 1e-06, %v34_v5 }
  0xa7   :  { %v33_v7 = vpop.xlane.xlu0 %32 }
  0xa8   :  { %75 = vrsqrt.f32 %v36_v6  ;;  %v35_v8 = vmul.f32 0.0078125, %v33_v7 }
  0xaa   :  { %v37_v9 = vadd.f32 1e-06, %v35_v8 }
  0xac   :  { %77 = vrsqrt.f32 %v37_v9 }
  0xb2   :  { %v76_v10 = vpop.eup %75 }
  0xb3   :  { %v40_v12 = vmul.f32 %v76_v10, %v26_v0 }
  0xb5   :  { %v49_v13 = vmul.f32 %v70_v11, %v40_v12 }
  0xb6   :  { %v78_v14 = vpop.eup %77 }
  0xb7   :  { %v41_v15 = vmul.f32 %v78_v14, %v27_v1  ;;  %51 = vst [vmem:[#allocation5] sm:$0xff] %v49_v13 }
  0xb9   :  { %v50_v16 = vmul.f32 %v70_v11, %v41_v15 }
  0xbb   :  { %52 = vst [vmem:[#allocation5 + $0x8] sm:$0xff] %v50_v16 }
  0xbc   :  { %112 = shalt.err (!%p109_p12)
}
  0xbd   :  { %s113_s1 = scalar_lea.hbm %s181_s2, 256 }
  0xbe   :  { %p114_p13 = scmp.ne.s32.totalorder %s181_s2, %s113_s1  ;;  %p117_p0 = scmp.lt.u32.totalorder %s113_s1, %s181_s2 }
  0xc0   :  { %p119_p1 = pnand %p117_p0, %p114_p13 }
  0xc2   :  { %122 = shalt.err (!%p119_p1)
}
  0xc3   :  { %64 = dma.vmem_to_hbm [thread:$0]  %s59_s25, 256, %s181_s2, [#allocation4], %s128_s19, %s128_s19, %s129_s20  }
  0xc4   :  { %125 = dma.done.wait [#allocation4], 256  }
  0xc5   :  { %126 = vsyncadd [#allocation4], 4294967040 }
  0xc6   :  { %68 = vsyncpa [#allocation3], 1 }
  0xc7   :  { %69 = vsyncpa [#allocation4], 1 }

</bundles_post_ra>
